<compile_context>
chip_gen: v6e
topology: v6e:2x2x1
jax: 0.10.0
libtpu: 0.0.40
codegen_flags: <defaults>
</compile_context>

<pallas_src>
import functools

import jax
import jax.numpy as jnp
from jax import lax
from jax.experimental import pallas as pl
from jax.experimental.pallas import tpu as pltpu


_FUSE_BYTES_LIMIT = 8 << 20  # fuse same-shape blocks only when maps are small


def _round_up(x, m):
    return (x + m - 1) // m * m


def _style_group_kernel(f_ref, tgt_ref, out_ref, gram_acc, *, inv_gram_norm):
    """Grid = (nb, nk): nb batch entries x nk hw-chunks (reduction axis last).

    f_ref   : (1, ch, tk)   feature chunk (native dtype)
    tgt_ref : (1, ch, ch)   target Gram matrix (f32)
    out_ref : (1, 8, 128)   per-batch-entry squared-error sum (broadcast)
    gram_acc: (ch, ch) f32  VMEM scratch, resident across the hw axis
    """
    k = pl.program_id(1)

    @pl.when(k == 0)
    def _():
        gram_acc[...] = jnp.zeros_like(gram_acc)

    f = f_ref[0]  # (ch, tk), native dtype -> MXU runs at native rate
    # NT matmul (contract over hw): g += f @ f^T without materializing f^T.
    gram_acc[...] += lax.dot_general(
        f, f,
        dimension_numbers=(((1,), (1,)), ((), ())),
        preferred_element_type=jnp.float32,
    )

    @pl.when(k == pl.num_programs(1) - 1)
    def _():
        diff = gram_acc[...] * inv_gram_norm - tgt_ref[0]
        sq = jnp.sum(diff * diff)
        # Lane-dense unmasked store; the wrapper reads element [b, 0, 0].
        out_ref[...] = jnp.broadcast_to(sq, out_ref.shape).astype(out_ref.dtype)


@functools.partial(jax.jit, static_argnames=("ch", "hw", "per_block_bs"))
def style_loss_group(f, target_gram, *, ch, hw, per_block_bs):
    """Sum over the blocks of a fused group of MSE(gram(f_b), target_b).

    f           : (nb, ch, hw)  flattened features (nb = n_blocks * bs)
    target_gram : (nb, ch, ch)  matching target Gram matrices
    """
    nb = f.shape[0]
    itemsize = jnp.dtype(f.dtype).itemsize
    lane = 128

    # hw chunk size: as large as fits a ~4 MiB/buffer budget, lane aligned.
    tk_max = max(lane, ((4 << 20) // max(ch * itemsize, 1)) // lane * lane)
    if hw <= tk_max:
        tk, nk, hw_pad = hw, 1, hw          # block == full dim, no padding
    else:
        hw_al = _round_up(hw, lane)
        nk = -(-hw_al // tk_max)            # ceil
        tk = _round_up(-(-hw_al // nk), lane)
        hw_pad = tk * nk

    if hw_pad != hw:
        # Zero padding along hw contributes nothing to the Gram matrix.
        f = jnp.pad(f, ((0, 0), (0, 0), (0, hw_pad - hw)))

    target_gram = target_gram.astype(jnp.float32)

    # Explicit VMEM limit: double-buffered f/tgt/out blocks + Gram scratch.
    ch8, chl = _round_up(ch, 8), max(_round_up(ch, lane), lane)
    est = (2 * ch8 * _round_up(tk, lane) * itemsize   # f (double buffered)
           + 2 * ch8 * chl * 4                        # target gram
           + ch8 * chl * 4                            # gram scratch
           + 2 * 8 * lane * 4)                        # output
    vmem_limit = int(min(48 << 20, max(16 << 20, 2 * est)))

    kernel = functools.partial(
        _style_group_kernel, inv_gram_norm=1.0 / float(ch * hw))

    out = pl.pallas_call(
        kernel,
        out_shape=jax.ShapeDtypeStruct((nb, 8, lane), jnp.float32),
        grid_spec=pltpu.PrefetchScalarGridSpec(
            num_scalar_prefetch=0,
            grid=(nb, nk),                             # reduction axis last
            in_specs=[
                pl.BlockSpec((1, ch, tk), lambda b, k: (b, 0, k)),
                pl.BlockSpec((1, ch, ch), lambda b, k: (b, 0, 0)),
            ],
            out_specs=pl.BlockSpec((1, 8, lane), lambda b, k: (b, 0, 0)),
            scratch_shapes=[pltpu.VMEM((ch, ch), jnp.float32)],
        ),
        compiler_params=pltpu.CompilerParams(
            dimension_semantics=("parallel", "arbitrary"),  # batch // 2 TCs on v7x
            vmem_limit_bytes=vmem_limit,
        ),
    )(f, target_gram)

    # F.mse_loss(reduction='mean') over (bs, ch, ch) per block, summed over the
    # blocks of this group (all group members share bs and ch).
    return jnp.sum(out[:, 0, 0]) / (per_block_bs * ch * ch)


def gram_matrix_ref(x):
    """Pure-JAX reference of StyleLossBlock.gram_matrix (NCHW input)."""
    bs, ch, h, w = x.shape
    f = x.reshape(bs, ch, h * w).astype(jnp.float32)
    return jnp.einsum("bcx,bdx->bcd", f, f) / (ch * h * w)


class StyleLossPallas:
    """JAX/Pallas port of StyleLoss.

    Target Gram matrices are "parameters" built deterministically in-script
    from synthetic style feature maps (no file / VGG loading).
    """

    # TODO(synk): load_style_from_file (imageio + PrunedVggModel) has no Pallas
    # equivalent; targets are built from in-script synthetic feature maps.

    def __init__(self, style_predictions, block_indices=None):
        if block_indices is None:
            block_indices = [1, 2, 3, 4, 5, 6, 7, 8]
        self._block_indices = list(block_indices)
        # Parameter init glue (plain JAX): gram_matrix(target).data
        self._target_grams = {
            idx: gram_matrix_ref(style_predictions[idx])
            for idx in self._block_indices
        }
        self._loaded = True

    def __call__(self, vgg_predictions):
        if not self._loaded:
            raise RuntimeError("Model must be loaded before first forward call")

        # Group blocks by (bs, ch, hw, dtype); fuse same-shape blocks into one
        # pallas_call when small (launch-bound regime), keep large maps
        # (memory-bound) as separate calls to avoid the concatenation copy.
        groups = {}
        for idx in self._block_indices:
            x = vgg_predictions[idx]
            bs, ch, h, w = x.shape
            small = x.size * jnp.dtype(x.dtype).itemsize <= _FUSE_BYTES_LIMIT
            key = (bs, ch, h * w, str(x.dtype)) if small else \
                  (bs, ch, h * w, str(x.dtype), idx)
            groups.setdefault(key, []).append(idx)

        total = jnp.float32(0.0)
        for key, idxs in groups.items():
            bs, ch, hw = key[0], key[1], key[2]
            if len(idxs) == 1:
                feats = vgg_predictions[idxs[0]].reshape(bs, ch, hw)
                tgts = self._target_grams[idxs[0]]
            else:
                feats = jnp.concatenate(
                    [vgg_predictions[i].reshape(bs, ch, hw) for i in idxs],
                    axis=0)
                tgts = jnp.concatenate(
                    [self._target_grams[i] for i in idxs], axis=0)
            total = total + style_loss_group(
                feats, tgts, ch=ch, hw=hw, per_block_bs=bs)
        return total


def style_loss_ref(vgg_predictions, target_grams, block_indices):
    """Pure-JAX reference for validation."""
    total = jnp.float32(0.0)
    for idx in block_indices:
        g = gram_matrix_ref(vgg_predictions[idx])
        total = total + jnp.mean((g - target_grams[idx]) ** 2)
    return total


if __name__ == "__main__":
    key = jax.random.PRNGKey(0)

    # Small synthetic "VGG feature pyramid": index 0 is an unused placeholder,
    # indices 1..4 are the style-loss blocks (NCHW with channel growth /
    # spatial downsampling).
    block_indices = [1, 2, 3, 4]
    bs = 2
    shapes = {
        0: (bs, 4, 16, 16),   # placeholder, not used by block_indices
        1: (bs, 8, 16, 16),
        2: (bs, 8, 16, 16),
        3: (bs, 16, 8, 8),
        4: (bs, 16, 8, 8),
    }

    # Deterministic synthetic "style image" features -> target Gram matrices.
    style_preds = {}
    k = key
    for idx, shp in shapes.items():
        k, sub = jax.random.split(k)
        style_preds[idx] = jax.random.normal(sub, shp, dtype=jnp.float32)

    model = StyleLossPallas(style_preds, block_indices=block_indices)

    # Deterministic synthetic "generated image" features (forward input).
    vgg = {}
    for idx, shp in shapes.items():
        k, sub = jax.random.split(k)
        vgg[idx] = jax.random.normal(sub, shp, dtype=jnp.float32)
    vgg_predictions = [vgg[i] for i in range(len(shapes))]

    loss = jax.block_until_ready(model(vgg_predictions))

    # Sanity check against the pure-JAX reference.
    ref = jax.block_until_ready(
        style_loss_ref(vgg_predictions, model._target_grams, block_indices))
    assert jnp.allclose(loss, ref, rtol=1e-5, atol=1e-5), (loss, ref)

    print("KERNEL_OK")
</pallas_src>

<mosaic_0001>
module attributes {stable_mosaic.version = 11 : i64} {
  func.func @_style_group_kernel(%arg0: i32, %arg1: i32, %arg2: memref<1x8x256xf32, #tpu.memory_space<vmem>>, %arg3: memref<1x8x8xf32, #tpu.memory_space<vmem>>, %arg4: memref<1x8x128xf32, #tpu.memory_space<vmem>>, %arg5: memref<8x8xf32, #tpu.memory_space<vmem>>) attributes {dimension_semantics = [#tpu.dimension_semantics<parallel>, #tpu.dimension_semantics<arbitrary>], iteration_bounds = array<i64: 4, 1>, scalar_prefetch = 0 : i64, scratch_operands = 1 : i64, tpu.core_type = #tpu.core_type<tc>, window_params = [{transform_indices = @transform_0, window_bounds = array<i64: 1, 8, 256>}, {transform_indices = @transform_1, window_bounds = array<i64: 1, 8, 8>}, {transform_indices = @transform_2, window_bounds = array<i64: 1, 8, 128>}]} {
    %c0_i32 = arith.constant 0 : i32
    %0 = arith.cmpi eq, %arg1, %c0_i32 : i32
    %1 = arith.extui %0 : i1 to i32
    %c0_i32_0 = arith.constant 0 : i32
    %2 = arith.cmpi ne, %1, %c0_i32_0 : i32
    scf.if %2 {
      %cst_9 = arith.constant 0.000000e+00 : f32
      %12 = vector.broadcast %cst_9 : f32 to vector<8x8xf32>
      %c0_10 = arith.constant 0 : index
      %c0_11 = arith.constant 0 : index
      %13 = vector.load %arg5[%c0_10, %c0_11] : memref<8x8xf32, #tpu.memory_space<vmem>>, vector<8x8xf32>
      tpu.vector_store %arg5[%c0_10, %c0_11], %12 {strides = array<i32>} : memref<8x8xf32, #tpu.memory_space<vmem>>, vector<8x8xf32>,
    } else {
    }
    %c0 = arith.constant 0 : index
    %c0_1 = arith.constant 0 : index
    %c0_2 = arith.constant 0 : index
    %3 = vector.load %arg2[%c0, %c0_1, %c0_2] : memref<1x8x256xf32, #tpu.memory_space<vmem>>, vector<1x8x256xf32>
    %4 = vector.shape_cast %3 : vector<1x8x256xf32> to vector<8x256xf32>
    %c0_3 = arith.constant 0 : index
    %c0_4 = arith.constant 0 : index
    %5 = vector.load %arg5[%c0_3, %c0_4] : memref<8x8xf32, #tpu.memory_space<vmem>>, vector<8x8xf32>
    %cst = arith.constant dense<0.000000e+00> : vector<8x8xf32>
    %6 = tpu.matmul %4, %4, %cst {dimension_numbers = #tpu.dot_dimension_numbers<[1], [1], [0], [0], [0, 0, 1, 0], [], []>} : vector<8x256xf32>, vector<8x256xf32>, vector<8x8xf32> -> vector<8x8xf32>
    %7 = arith.addf %5, %6 : vector<8x8xf32>
    %c0_5 = arith.constant 0 : index
    %c0_6 = arith.constant 0 : index
    %8 = vector.load %arg5[%c0_5, %c0_6] : memref<8x8xf32, #tpu.memory_space<vmem>>, vector<8x8xf32>
    tpu.vector_store %arg5[%c0_5, %c0_6], %7 {strides = array<i32>} : memref<8x8xf32, #tpu.memory_space<vmem>>, vector<8x8xf32>,
    %c0_i32_7 = arith.constant 0 : i32
    %9 = arith.cmpi eq, %arg1, %c0_i32_7 : i32
    %10 = arith.extui %9 : i1 to i32
    %c0_i32_8 = arith.constant 0 : i32
    %11 = arith.cmpi ne, %10, %c0_i32_8 : i32
    scf.if %11 {
      %c0_9 = arith.constant 0 : index
      %c0_10 = arith.constant 0 : index
      %12 = vector.load %arg5[%c0_9, %c0_10] : memref<8x8xf32, #tpu.memory_space<vmem>>, vector<8x8xf32>
      %cst_11 = arith.constant 4.8828125E-4 : f32
      %13 = vector.broadcast %cst_11 : f32 to vector<8x8xf32>
      %14 = arith.mulf %12, %13 : vector<8x8xf32>
      %c0_12 = arith.constant 0 : index
      %c0_13 = arith.constant 0 : index
      %c0_14 = arith.constant 0 : index
      %15 = vector.load %arg3[%c0_12, %c0_13, %c0_14] : memref<1x8x8xf32, #tpu.memory_space<vmem>>, vector<1x8x8xf32>
      %16 = vector.shape_cast %15 : vector<1x8x8xf32> to vector<8x8xf32>
      %17 = arith.subf %14, %16 : vector<8x8xf32>
      %18 = arith.mulf %17, %17 : vector<8x8xf32>
      %19 = vector.shape_cast %18 : vector<8x8xf32> to vector<1x8x8xf32>
      %cst_15 = arith.constant dense<0.000000e+00> : vector<1xf32>
      %20 = vector.multi_reduction <add>, %19, %cst_15 [1, 2] : vector<1x8x8xf32> to vector<1xf32>
      %21 = vector.shape_cast %20 : vector<1xf32> to vector<1x1x1xf32>
      %22 = vector.extract %21[0, 0, 0] : f32 from vector<1x1x1xf32>
      %23 = vector.broadcast %22 : f32 to vector<1x8x128xf32>
      %c0_16 = arith.constant 0 : index
      %c0_17 = arith.constant 0 : index
      %c0_18 = arith.constant 0 : index
      %24 = vector.load %arg4[%c0_16, %c0_17, %c0_18] : memref<1x8x128xf32, #tpu.memory_space<vmem>>, vector<1x8x128xf32>
      tpu.vector_store %arg4[%c0_16, %c0_17, %c0_18], %23 {strides = array<i32>} : memref<1x8x128xf32, #tpu.memory_space<vmem>>, vector<1x8x128xf32>,
    } else {
    }
    return
  }
  func.func @transform_0(%arg0: i32, %arg1: i32) -> (i32, i32, i32) {
    %c0_i32 = arith.constant 0 : i32
    %c0_i32_0 = arith.constant 0 : i32
    return %arg0, %c0_i32, %arg1 : i32, i32, i32
  }
  func.func @transform_1(%arg0: i32, %arg1: i32) -> (i32, i32, i32) {
    %c0_i32 = arith.constant 0 : i32
    %c0_i32_0 = arith.constant 0 : i32
    %c0_i32_1 = arith.constant 0 : i32
    return %arg0, %c0_i32, %c0_i32_0 : i32, i32, i32
  }
  func.func @transform_2(%arg0: i32, %arg1: i32) -> (i32, i32, i32) {
    %c0_i32 = arith.constant 0 : i32
    %c0_i32_0 = arith.constant 0 : i32
    %c0_i32_1 = arith.constant 0 : i32
    return %arg0, %c0_i32, %c0_i32_0 : i32, i32, i32
  }
}

</mosaic_0001>

<bundles_post_ra>
// kernel: style_loss_group.1
= control target key start
LH: loop header
LB: loop body
LE: loop exit
PB: predicated region body
PF: predicated region fallthrough
CT: control target
= control target key end

     0   :  { %7 = vsyncpa [#allocation4], 0  ;;  %s755_s0 = inlined_call_operand.hbm [shape: f32[4,8,256], index: 0, kind: input, shape index: {}]   ;;  %s756_s1 = inlined_call_operand.hbm [shape: f32[4,8,8], index: 1, kind: input, shape index: {}]   ;;  %s757_s2 = inlined_call_operand.vmem [shape: f32[4,8,128], index: 2, kind: output, shape index: {}]  }
   0x1   :  { %9 = vsyncpa [#allocation4 + $0x1], 0 }
   0x2   :  { %10 = vsyncpa [#allocation6], 0 }
   0x3   :  { %12 = vsyncpa [#allocation6 + $0x1], 0  ;;  %s624_s9 = smov 0   ;;  %s626_s10 = smov 0  }
   0x4   :  { %s628_s11 = smov 0   ;;  %s630_s12 = smov 0  }
   0x5   :  { %s632_s13 = smov 0   ;;  %s634_s14 = smov 0  }
   0x6 LB: > { %s415_s15 = sadd.s32 4294967295, %s604_s14   ;;  %s30_s16 = sadd.s32 1, %s600_s13  ;;  %s604_s14 = sphi %s634_s14, %s18_s14   ;;  %s600_s13 = sphi %s632_s13, %s766_s13   ;;  %s596_s12 = sphi %s630_s12, %s765_s12   ;;  %s592_s11 = sphi %s628_s11, %s764_s11   ;;  %s588_s10 = sphi %s626_s10, %s763_s10   ;;  %s584_s9 = sphi %s624_s9, %s762_s9  }
   0x7   : > { %p32_p0 = scmp.ge.s32.totalorder %s30_s16, 4  ;;  %s39_s17 = sadd.s32 1, %s592_s11 }
   0x8   : > { %p46_p1 = scmp.ne.s32.totalorder %s592_s11, %s588_s10  ;;  %p47_p2 = scmp.eq.s32.totalorder %s604_s14, 0 }
   0x9   : > { %s768_s16 = smov (%p32_p0, %s30_s16), 0  ;;  %p52_p4 = scmp.ne.s32.totalorder %s588_s10, %s584_s9 }
   0xa   : > { %p660_p3 = por %p47_p2, %p46_p1  ;;  %s34_s19 = ssub.s32 %s600_s13, %s768_s16 }
   0xb   : > { %p53_p5 = scmp.eq.s32.totalorder %s415_s15, 0  ;;  %p37_p6 = scmp.eq.s32.totalorder %s34_s19, 0 }
   0xc   : > { %p444_p8 = scmp.lt.s32.totalorder %s604_s14, 4  ;;  %s676_s22 = sand.u32 1, %s592_s11  }
   0xd   : > { %p667_p7 = por %p53_p5, %p52_p4  ;;  %s430_s23 = sshll.u32 %s600_s13, 8 }
   0xe   : > { %s673_s21 = scalar_select %p37_p6, %s592_s11, %s39_s17  }
   0xf   : > { %s419_s24 = sshll.u32 %s676_s22, 4  ;;  %s140_s27 = scalar_lea.hbm %s755_s0, %s430_s23 }
  0x10   : > { %s132_s28 = scalar_lea.vmem [#allocation3], %s419_s24  ;;  %p685_p9 = pnand %p444_p8, %p660_p3 }
  0x11   : > { %s142_s29 = sshll.u32 %s132_s28, 4  ;;  %p424_p10 = scmp.ge.s32.totalorder %s604_s14, 1  ;;  %s143_s29 = int_to_ptr.vmem [resolvable:$true] %s142_s29 }
  0x12   : > { %p165_p11 = scmp.lt.s32.totalorder %s604_s14, 5  ;;  %s129_s3 = scalar_lea.sflag [#allocation4], %s676_s22 }
  0x13   : > { %p496_p12 = pneg %p685_p9  ;;  %s507_s4 = scalar_lea.vmem %s143_s29, 256 }
  0x14   : > { %p508_p13 = scmp.ne.s32.totalorder %s143_s29, %s507_s4  ;;  %s606_s5 = smov [#allocation3]  }
  0x15   : > { %s512_s6 = sshll.u32 %s606_s5, 4  ;;  %s513_s6 = int_to_ptr.vmem [resolvable:$false] %s512_s6 }
  0x16   : > { %p510_p0 = pnand %p508_p13, %p496_p12  ;;  %s514_s7 = scalar_lea.vmem %s513_s6, 512 }
  0x17   : > { %p515_p2 = scmp.lt.s32.totalorder %s143_s29, %s513_s6  ;;  %p516_p3 = scmp.lt.s32.totalorder %s514_s7, %s507_s4 }
  0x18   : > { %p511_p1 = pneg %p510_p0 }
  0x19   : > { %p517_p4 = por %p516_p3, %p515_p2 }
  0x1b   : > { %p518_p5 = pnand %p517_p4, %p511_p1 }
  0x1d   : > { %521 = shalt.err (!%p518_p5)
}
  0x1e   : > { %440 = dma.hbm_to_vmem [thread:$0]  (!%p685_p9), %s140_s27, 256, %s143_s29, %s129_s3  }
  0x1f   : > { %p703_p6 = pnand %p424_p10, %p165_p11  ;;  %s422_s9 = sshll.u32 %s676_s22, 3 }
  0x20   : > { %s423_s15 = sshll.u32 %s600_s13, 7  ;;  %s153_s23 = scalar_lea.vmem [#allocation5], %s422_s9 }
  0x21   : > { %s158_s19 = scalar_lea.hbm %s756_s1, %s423_s15  ;;  %s160_s24 = sshll.u32 %s153_s23, 4  ;;  %s161_s24 = int_to_ptr.vmem [resolvable:$true] %s160_s24 }
  0x22   : > { %s150_s25 = scalar_lea.sflag [#allocation6], %s676_s22  ;;  %s535_s26 = scalar_lea.vmem %s161_s24, 128 }
  0x23   : > { %p536_p8 = scmp.ne.s32.totalorder %s161_s24, %s535_s26  ;;  %s607_s27 = smov [#allocation5]  }
  0x24   : > { %s540_s28 = sshll.u32 %s607_s27, 4  ;;  %s541_s28 = int_to_ptr.vmem [resolvable:$false] %s540_s28 }
  0x25   : > { %p538_p13 = pnand %p536_p8, %p496_p12  ;;  %s542_s29 = scalar_lea.vmem %s541_s28, 256 }
  0x26   : > { %p543_p10 = scmp.lt.s32.totalorder %s161_s24, %s541_s28  ;;  %p544_p11 = scmp.lt.s32.totalorder %s542_s29, %s535_s26 }
  0x27   : > { %p539_p0 = pneg %p538_p13 }
  0x28   : > { %p545_p1 = por %p544_p11, %p543_p10 }
  0x2a   : > { %p546_p2 = pnand %p545_p1, %p539_p0 }
  0x2c   : > { %549 = shalt.err (!%p546_p2)
}
  0x2d   : > { %443 = dma.hbm_to_vmem [thread:$0]  (!%p685_p9), %s158_s19, 128, %s161_s24, %s150_s25  }
  0x2e   : > { %169 = sbr.rel (%p703_p6) target bundleno = 472 (0x1d8), region = 28  ;;  %s171_s22 = sand.u32 (!%p703_p6), 1, %s588_s10  }
  0x2f   : > { %s425_s3 = sshll.u32 (!%p703_p6), %s171_s22, 4  ;;  %s172_s4 = scalar_lea.sflag (!%p703_p6), [#allocation4], %s171_s22 }
  0x30   : > { %s175_s5 = scalar_lea.vmem (!%p703_p6), [#allocation3], %s425_s3 }
  0x33   : > { %575 = dma.done.wait (%p667_p7), %s172_s4, 256  }
  0x34   : > { %577 = vsyncadd (%p667_p7), %s172_s4, 4294967040  ;;  %s426_s6 = sshll.u32 %s171_s22, 3  ;;  %s181_s7 = scalar_lea.sflag [#allocation6], %s171_s22 }
  0x35   : > { %s184_s9 = scalar_lea.vmem [#allocation5], %s426_s6 }
  0x36   : > { %579 = dma.done.wait (%p667_p7), %s181_s7, 128  }
  0x37   : > { %581 = vsyncadd (%p667_p7), %s181_s7, 4294967168  ;;  %vm218_vm0 = vcmask 64512   ;;  %v608_v0 = vmov 0.0   ;;  %v221_v1 = vld [vmem:[%s175_s5 + $0x8] sm:$0xff]  ;;  %v220_v2 = vld [vmem:[%s175_s5] sm:$0xff]  ;;  %p210_p7 = scmp.lt.s32.totalorder %s596_s12, 3 }
  0x38   : > { %219 = vst.msk [vmem:[#allocation2] sm:$0xff] %vm218_vm0, %v608_v0  ;;  %253 = vmatprep.subr.mxu0 %v221_v1  ;;  %287 = vmatprep.mubr.f32.mxu0 %v221_v1  ;;  %v301_v8 = vld [vmem:[%s184_s9] sm:$0xff] }
  0x39   : > { %254 = vmatpush1.xpose.msra.mxu0 %v220_v2  ;;  %s770_s12 = smov (!%p210_p7, %s596_s12), 3 }
  0x3a   : > { %s427_s20 = sshll.u32 %s770_s12, 3 }
  0x3b   : > { %s213_s15 = scalar_lea.vmem %s757_s2, %s427_s20 }
  0x3c   : > { %288 = vmatmul.mubr.f32.vlgmr.msra.gmra.mxu0 %v220_v2 }
  0x3f   : > { %v222_v3 = vld [vmem:[#allocation2] sm:$0xff] }
  0xfc   : > { %v289_v4 = vpop.f32.mrf.mxu0 }
  0xfd   : > { %v293_v5 = vadd.f32 %v289_v4, %v222_v3 }
  0xfe   : > { %v291_v6 = vpop.f32.mrf.mxu0 }
  0xff   : > { %295 = vst.msk [vmem:[#allocation2] sm:$0xff] %vm218_vm0, %v293_v5 }
 0x106   : > { %v299_v7 = vld [vmem:[#allocation2] sm:$0xff] }
 0x107   : > { %v300_v9 = vmul.f32 0.00048828125, %v299_v7 }
 0x109   : > { %v302_v10 = vsub.f32 %v300_v9, %v301_v8 }
 0x10b   : > { %v303_v11 = vmul.f32 %v302_v10, %v302_v10 }
 0x10d   : > { %v304_v12 = vsel %vm218_vm0, %v303_v11, 0.0 }
 0x10e   : > { %305 = vadd.xlane.f32.xlu0 %v304_v12 }
 0x197   : > { %v306_v13 = vpop.xlane.xlu0 %305 }
 0x198   : > { %v307_v14 = vrot.slane %v306_v13, 4 }
 0x19a   : > { %v308_v15 = vadd.f32 %v307_v14, %v306_v13 }
 0x19c   : > { %v309_v16 = vrot.slane %v308_v15, 2 }
 0x19e   : > { %v310_v17 = vadd.f32 %v309_v16, %v308_v15 }
 0x1a0   : > { %v311_v18 = vrot.slane %v310_v17, 1 }
 0x1a2   : > { %v312_v19 = vadd.f32 %v311_v18, %v310_v17 }
 0x1a4   : > { %431 = vpush %v312_v19 }
 0x1d5   : > { %s432_s17 = spop %431 }
 0x1d6   : > { %v314_v20 = vstv %s432_s17 }
 0x1d7   : > { %315 = vst [vmem:[%s213_s15] sm:$0xff] %v314_v20 }
 0x1d8 PF: > { %s18_s14 = sadd.s32 1, %s604_s14   ;;  %s762_s9 = smov %s588_s10 }
 0x1d9   : > { %p15_p9 = scmp.ge.s32.totalorder %s18_s14, 6   ;;  %s763_s10 = smov %s592_s11 }
 0x1da   : > { %s764_s11 = smov %s673_s21  ;;  %s765_s12 = smov %s600_s13 }
 0x1db   : > { %s766_s13 = smov %s768_s16  ;;  %17 = sbr.rel (!%p15_p9) target bundleno = 6 (0x6), region = 89 }
 0x1e0   :  { %335 = vsyncpa [#allocation4], 1 }
 0x1e1   :  { %337 = vsyncpa [#allocation4 + $0x1], 1 }
 0x1e2   :  { %338 = vsyncpa [#allocation6], 1 }
 0x1e3   :  { %340 = vsyncpa [#allocation6 + $0x1], 1 }

</bundles_post_ra>
